<compile_context>
chip_gen: v6e
topology: v6e:2x2x1
jax: 0.10.0
libtpu: 0.0.40
codegen_flags: <defaults>
</compile_context>

<pallas_src>
import functools

import jax
import jax.numpy as jnp
from jax.experimental import pallas as pl
from jax.experimental.pallas import tpu as pltpu


def _round_up(x, m):
    return (x + m - 1) // m * m


def _pick_block_rows(ho, wo, requested, target_m=512):
    """Largest divisor of Ho giving a sublane-aligned tile with rows*Wo <= target."""
    if requested is not None:
        if ho % requested != 0:
            raise ValueError("block_rows must divide the output height")
        m = requested * wo
        if requested != ho and m % 8 != 0:
            raise ValueError("block_rows*Wo must be a multiple of 8")
        return requested
    best = None
    for tr in range(1, ho + 1):
        if ho % tr != 0:
            continue
        m = tr * wo
        if tr != ho and m % 8 != 0:     # keep output stores unmasked
            continue
        if m <= target_m:
            best = tr
    if best is None:                     # fall back to one full-height tile
        best = ho
    return best


def _pick_cout_tile(cp, cap=256):
    """Largest multiple of 128 that divides the padded Cout, at most `cap`."""
    best = 128
    t = 128
    while t <= min(cp, cap):
        if cp % t == 0:
            best = t
        t += 128
    return best


def _make_conv_bn_silu_kernel(kh, kw, stride, block_rows, wo, cin):
    m = block_rows * wo

    def kernel(x_ref, w_ref, b_ref, o_ref):
        # x_ref: (1, Hp, Wp, Cin)  whole padded image for this batch element
        #        (block index constant across the inner grid axes -> fetched
        #        once per batch element, no im2col amplification).
        # w_ref: (kh*kw, Cin, Cout_tile)  BN-scale-folded conv weights
        # b_ref: (1, Cout_tile)           fused BN bias (f32)
        # o_ref: (1, block_rows*Wo, Cout_tile)  lane-dense output tile
        r = pl.program_id(2)
        row0 = pl.multiple_of(r * (block_rows * stride), block_rows * stride)
        tc = o_ref.shape[-1]

        acc = jnp.zeros((m, tc), jnp.float32)
        tap = 0
        for i in range(kh):
            for j in range(kw):
                if stride == 1:
                    patch = x_ref[0, pl.ds(row0 + i, block_rows),
                                  pl.ds(j, wo), :]
                else:
                    patch = x_ref[0, pl.ds(row0 + i, block_rows, stride),
                                  pl.ds(j, wo, stride), :]
                # (block_rows, Wo, Cin) -> (M, Cin); MXU matmul, f32 accumulate.
                acc = acc + jnp.dot(patch.reshape(m, cin), w_ref[tap],
                                    preferred_element_type=jnp.float32)
                tap += 1

        y = acc + b_ref[...]           # fused BatchNorm bias (scale in weights)
        y = y * jax.nn.sigmoid(y)      # SiLU, f32 epilogue
        o_ref[0] = y.astype(o_ref.dtype)

    return kernel


@functools.partial(jax.jit,
                   static_argnames=("ksize", "stride", "eps", "block_rows",
                                    "cout_tile"))
def base_conv_forward(x_nchw, weight_oihw, gamma, beta, run_mean, run_var,
                      *, ksize, stride, eps=1e-5, block_rows=None,
                      cout_tile=None):
    """BaseConv forward: act(bn(conv(x))). Input/output are NCHW (PyTorch)."""
    pad = (ksize - 1) // 2
    n, cin, h, w = x_nchw.shape
    cout = weight_oihw.shape[0]
    if weight_oihw.shape[1] != cin:
        raise NotImplementedError("groups > 1 is not supported")
    ho = (h + 2 * pad - ksize) // stride + 1
    wo = (w + 2 * pad - ksize) // stride + 1
    hp, wp = h + 2 * pad, w + 2 * pad

    tr = _pick_block_rows(ho, wo, block_rows)
    r_tiles = ho // tr
    m = tr * wo
    cdtype = x_nchw.dtype
    cp = _round_up(cout, 128)          # lane-dense output slab
    tc = cout_tile if cout_tile is not None else _pick_cout_tile(cp)
    if tc % 128 != 0 or cp % tc != 0:
        raise ValueError("cout_tile must be a multiple of 128 dividing padded Cout")
    c_tiles = cp // tc

    # NCHW -> padded NHWC (pure layout glue; no im2col materialization).
    x_nhwc = jnp.transpose(x_nchw, (0, 2, 3, 1))
    xp = jnp.pad(x_nhwc, ((0, 0), (pad, pad), (pad, pad), (0, 0)))

    # Fold BatchNorm (inference) into the weights + a single bias vector.
    inv_std = 1.0 / jnp.sqrt(run_var.astype(jnp.float32) + eps)
    scale = gamma.astype(jnp.float32) * inv_std                   # (Cout,)
    bias = beta.astype(jnp.float32) - run_mean.astype(jnp.float32) * scale

    # (Cout, Cin, KH, KW) -> (KH*KW, Cin, Cout), scale folded per out-channel,
    # padded lane-dense and cast to the compute dtype.
    w_taps = jnp.transpose(weight_oihw.astype(jnp.float32), (2, 3, 1, 0))
    w_taps = (w_taps * scale).reshape(ksize * ksize, cin, cout)
    w_taps = jnp.pad(w_taps, ((0, 0), (0, 0), (0, cp - cout))).astype(cdtype)
    bias_p = jnp.pad(bias, (0, cp - cout)).reshape(1, cp)         # stays f32

    kernel = _make_conv_bn_silu_kernel(ksize, ksize, stride, tr, wo, cin)

    # Rough VMEM estimate (image resident + double-buffered tiles + f32 acc).
    itemsize = jnp.dtype(cdtype).itemsize
    est = (hp * wp * cin * itemsize
           + 2 * ksize * ksize * cin * tc * itemsize
           + 2 * m * tc * itemsize
           + m * tc * 4
           + 2 * tc * 4)
    vmem_limit = int(min(100 * 2 ** 20, max(32 * 2 ** 20, 2 * est)))

    out_flat = pl.pallas_call(
        kernel,
        out_shape=jax.ShapeDtypeStruct((n, ho * wo, cp), cdtype),
        grid_spec=pltpu.PrefetchScalarGridSpec(
            num_scalar_prefetch=0,
            grid=(n, c_tiles, r_tiles),
            in_specs=[
                # Whole padded image per batch element (revisited across c, r).
                pl.BlockSpec((1, hp, wp, cin), lambda b, c, r: (b, 0, 0, 0)),
                pl.BlockSpec((ksize * ksize, cin, tc), lambda b, c, r: (0, 0, c)),
                pl.BlockSpec((1, tc), lambda b, c, r: (0, c)),
            ],
            out_specs=pl.BlockSpec((1, m, tc), lambda b, c, r: (b, r, c)),
        ),
        compiler_params=pltpu.CompilerParams(
            dimension_semantics=("parallel", "parallel", "arbitrary"),
            vmem_limit_bytes=vmem_limit),
    )(xp, w_taps, bias_p)

    # (N, Ho*Wo, Cout_p) -> slice channel padding -> NCHW.
    out_nhwc = out_flat.reshape(n, ho, wo, cp)[..., :cout]
    return jnp.transpose(out_nhwc, (0, 3, 1, 2))


def _reference(x_nchw, weight_oihw, gamma, beta, run_mean, run_var,
               ksize, stride, eps=1e-5):
    pad = (ksize - 1) // 2
    y = jax.lax.conv_general_dilated(
        x_nchw, weight_oihw, window_strides=(stride, stride),
        padding=((pad, pad), (pad, pad)),
        dimension_numbers=("NCHW", "OIHW", "NCHW"))
    sc = (gamma / jnp.sqrt(run_var + eps))[None, :, None, None]
    bi = (beta - run_mean * gamma / jnp.sqrt(run_var + eps))[None, :, None, None]
    y = y * sc + bi
    return y * jax.nn.sigmoid(y)


if __name__ == "__main__":
    key = jax.random.PRNGKey(0)
    k_x, k_w, k_g, k_b, k_m, k_v = jax.random.split(key, 6)

    N, Cin, H, W = 2, 4, 16, 16
    Cout, ksize, stride = 8, 3, 1

    x = jax.random.normal(k_x, (N, Cin, H, W), dtype=jnp.float32)
    weight = jax.random.normal(k_w, (Cout, Cin, ksize, ksize),
                               dtype=jnp.float32) * 0.1
    gamma = 1.0 + 0.1 * jax.random.normal(k_g, (Cout,), dtype=jnp.float32)
    beta = 0.1 * jax.random.normal(k_b, (Cout,), dtype=jnp.float32)
    run_mean = 0.05 * jax.random.normal(k_m, (Cout,), dtype=jnp.float32)
    run_var = jnp.abs(1.0 + 0.1 * jax.random.normal(k_v, (Cout,),
                                                    dtype=jnp.float32))

    # block_rows=8 -> M=128 spatial tiles, grid=(2, 1, 2): exercises the
    # multi-step spatial pipeline and the per-batch input revisit path.
    out = base_conv_forward(x, weight, gamma, beta, run_mean, run_var,
                            ksize=ksize, stride=stride, block_rows=8)
    out = jax.block_until_ready(out)

    ref = _reference(x, weight, gamma, beta, run_mean, run_var, ksize, stride)
    assert out.shape == (N, Cout, H, W)
    assert out.dtype == x.dtype
    assert jnp.allclose(out, ref, atol=2e-4, rtol=2e-4)

    print("KERNEL_OK")
</pallas_src>

<mosaic_0001>
module attributes {stable_mosaic.version = 11 : i64} {
  func.func @kernel(%arg0: i32, %arg1: i32, %arg2: i32, %arg3: memref<1x18x18x4xf32, #tpu.memory_space<vmem>>, %arg4: memref<9x4x128xf32, #tpu.memory_space<vmem>>, %arg5: memref<1x128xf32, #tpu.memory_space<vmem>>, %arg6: memref<1x128x128xf32, #tpu.memory_space<vmem>>) attributes {dimension_semantics = [#tpu.dimension_semantics<parallel>, #tpu.dimension_semantics<parallel>, #tpu.dimension_semantics<arbitrary>], iteration_bounds = array<i64: 2, 1, 2>, scalar_prefetch = 0 : i64, scratch_operands = 0 : i64, tpu.core_type = #tpu.core_type<tc>, window_params = [{transform_indices = @transform_0, window_bounds = array<i64: 1, 18, 18, 4>}, {transform_indices = @transform_1, window_bounds = array<i64: 9, 4, 128>}, {transform_indices = @transform_2, window_bounds = array<i64: 1, 128>}, {transform_indices = @transform_3, window_bounds = array<i64: 1, 128, 128>}]} {
    %c8_i32 = arith.constant 8 : i32
    %0 = arith.muli %arg2, %c8_i32 : i32
    %1 = tpu.assume_multiple %0, 8 : i32
    %cst = arith.constant 0.000000e+00 : f32
    %2 = vector.broadcast %cst : f32 to vector<128x128xf32>
    %c0_i32 = arith.constant 0 : i32
    %3 = arith.addi %1, %c0_i32 : i32
    %c0 = arith.constant 0 : index
    %4 = arith.index_cast %3 : i32 to index
    %c0_0 = arith.constant 0 : index
    %c0_1 = arith.constant 0 : index
    %5 = vector.load %arg3[%c0, %4, %c0_0, %c0_1] : memref<1x18x18x4xf32, #tpu.memory_space<vmem>>, vector<1x8x16x4xf32>
    %6 = vector.shape_cast %5 : vector<1x8x16x4xf32> to vector<8x16x4xf32>
    %7 = vector.shape_cast %6 : vector<8x16x4xf32> to vector<128x4xf32>
    %c0_2 = arith.constant 0 : index
    %c0_3 = arith.constant 0 : index
    %c0_4 = arith.constant 0 : index
    %8 = vector.load %arg4[%c0_2, %c0_3, %c0_4] : memref<9x4x128xf32, #tpu.memory_space<vmem>>, vector<1x4x128xf32>
    %9 = vector.shape_cast %8 : vector<1x4x128xf32> to vector<4x128xf32>
    %cst_5 = arith.constant dense<0.000000e+00> : vector<128x128xf32>
    %10 = tpu.matmul %7, %9, %cst_5 {dimension_numbers = #tpu.dot_dimension_numbers<[1], [0], [0], [1], [0, 0, 1, 1], [], []>} : vector<128x4xf32>, vector<4x128xf32>, vector<128x128xf32> -> vector<128x128xf32>
    %11 = arith.addf %2, %10 : vector<128x128xf32>
    %c0_i32_6 = arith.constant 0 : i32
    %12 = arith.addi %1, %c0_i32_6 : i32
    %c0_7 = arith.constant 0 : index
    %13 = arith.index_cast %12 : i32 to index
    %c1 = arith.constant 1 : index
    %c0_8 = arith.constant 0 : index
    %14 = vector.load %arg3[%c0_7, %13, %c1, %c0_8] : memref<1x18x18x4xf32, #tpu.memory_space<vmem>>, vector<1x8x16x4xf32>
    %15 = vector.shape_cast %14 : vector<1x8x16x4xf32> to vector<8x16x4xf32>
    %16 = vector.shape_cast %15 : vector<8x16x4xf32> to vector<128x4xf32>
    %c1_9 = arith.constant 1 : index
    %c0_10 = arith.constant 0 : index
    %c0_11 = arith.constant 0 : index
    %17 = vector.load %arg4[%c1_9, %c0_10, %c0_11] : memref<9x4x128xf32, #tpu.memory_space<vmem>>, vector<1x4x128xf32>
    %18 = vector.shape_cast %17 : vector<1x4x128xf32> to vector<4x128xf32>
    %cst_12 = arith.constant dense<0.000000e+00> : vector<128x128xf32>
    %19 = tpu.matmul %16, %18, %cst_12 {dimension_numbers = #tpu.dot_dimension_numbers<[1], [0], [0], [1], [0, 0, 1, 1], [], []>} : vector<128x4xf32>, vector<4x128xf32>, vector<128x128xf32> -> vector<128x128xf32>
    %20 = arith.addf %11, %19 : vector<128x128xf32>
    %c0_i32_13 = arith.constant 0 : i32
    %21 = arith.addi %1, %c0_i32_13 : i32
    %c0_14 = arith.constant 0 : index
    %22 = arith.index_cast %21 : i32 to index
    %c2 = arith.constant 2 : index
    %c0_15 = arith.constant 0 : index
    %23 = vector.load %arg3[%c0_14, %22, %c2, %c0_15] : memref<1x18x18x4xf32, #tpu.memory_space<vmem>>, vector<1x8x16x4xf32>
    %24 = vector.shape_cast %23 : vector<1x8x16x4xf32> to vector<8x16x4xf32>
    %25 = vector.shape_cast %24 : vector<8x16x4xf32> to vector<128x4xf32>
    %c2_16 = arith.constant 2 : index
    %c0_17 = arith.constant 0 : index
    %c0_18 = arith.constant 0 : index
    %26 = vector.load %arg4[%c2_16, %c0_17, %c0_18] : memref<9x4x128xf32, #tpu.memory_space<vmem>>, vector<1x4x128xf32>
    %27 = vector.shape_cast %26 : vector<1x4x128xf32> to vector<4x128xf32>
    %cst_19 = arith.constant dense<0.000000e+00> : vector<128x128xf32>
    %28 = tpu.matmul %25, %27, %cst_19 {dimension_numbers = #tpu.dot_dimension_numbers<[1], [0], [0], [1], [0, 0, 1, 1], [], []>} : vector<128x4xf32>, vector<4x128xf32>, vector<128x128xf32> -> vector<128x128xf32>
    %29 = arith.addf %20, %28 : vector<128x128xf32>
    %c1_i32 = arith.constant 1 : i32
    %30 = arith.addi %1, %c1_i32 : i32
    %c0_20 = arith.constant 0 : index
    %31 = arith.index_cast %30 : i32 to index
    %c0_21 = arith.constant 0 : index
    %c0_22 = arith.constant 0 : index
    %32 = vector.load %arg3[%c0_20, %31, %c0_21, %c0_22] : memref<1x18x18x4xf32, #tpu.memory_space<vmem>>, vector<1x8x16x4xf32>
    %33 = vector.shape_cast %32 : vector<1x8x16x4xf32> to vector<8x16x4xf32>
    %34 = vector.shape_cast %33 : vector<8x16x4xf32> to vector<128x4xf32>
    %c3 = arith.constant 3 : index
    %c0_23 = arith.constant 0 : index
    %c0_24 = arith.constant 0 : index
    %35 = vector.load %arg4[%c3, %c0_23, %c0_24] : memref<9x4x128xf32, #tpu.memory_space<vmem>>, vector<1x4x128xf32>
    %36 = vector.shape_cast %35 : vector<1x4x128xf32> to vector<4x128xf32>
    %cst_25 = arith.constant dense<0.000000e+00> : vector<128x128xf32>
    %37 = tpu.matmul %34, %36, %cst_25 {dimension_numbers = #tpu.dot_dimension_numbers<[1], [0], [0], [1], [0, 0, 1, 1], [], []>} : vector<128x4xf32>, vector<4x128xf32>, vector<128x128xf32> -> vector<128x128xf32>
    %38 = arith.addf %29, %37 : vector<128x128xf32>
    %c1_i32_26 = arith.constant 1 : i32
    %39 = arith.addi %1, %c1_i32_26 : i32
    %c0_27 = arith.constant 0 : index
    %40 = arith.index_cast %39 : i32 to index
    %c1_28 = arith.constant 1 : index
    %c0_29 = arith.constant 0 : index
    %41 = vector.load %arg3[%c0_27, %40, %c1_28, %c0_29] : memref<1x18x18x4xf32, #tpu.memory_space<vmem>>, vector<1x8x16x4xf32>
    %42 = vector.shape_cast %41 : vector<1x8x16x4xf32> to vector<8x16x4xf32>
    %43 = vector.shape_cast %42 : vector<8x16x4xf32> to vector<128x4xf32>
    %c4 = arith.constant 4 : index
    %c0_30 = arith.constant 0 : index
    %c0_31 = arith.constant 0 : index
    %44 = vector.load %arg4[%c4, %c0_30, %c0_31] : memref<9x4x128xf32, #tpu.memory_space<vmem>>, vector<1x4x128xf32>
    %45 = vector.shape_cast %44 : vector<1x4x128xf32> to vector<4x128xf32>
    %cst_32 = arith.constant dense<0.000000e+00> : vector<128x128xf32>
    %46 = tpu.matmul %43, %45, %cst_32 {dimension_numbers = #tpu.dot_dimension_numbers<[1], [0], [0], [1], [0, 0, 1, 1], [], []>} : vector<128x4xf32>, vector<4x128xf32>, vector<128x128xf32> -> vector<128x128xf32>
    %47 = arith.addf %38, %46 : vector<128x128xf32>
    %c1_i32_33 = arith.constant 1 : i32
    %48 = arith.addi %1, %c1_i32_33 : i32
    %c0_34 = arith.constant 0 : index
    %49 = arith.index_cast %48 : i32 to index
    %c2_35 = arith.constant 2 : index
    %c0_36 = arith.constant 0 : index
    %50 = vector.load %arg3[%c0_34, %49, %c2_35, %c0_36] : memref<1x18x18x4xf32, #tpu.memory_space<vmem>>, vector<1x8x16x4xf32>
    %51 = vector.shape_cast %50 : vector<1x8x16x4xf32> to vector<8x16x4xf32>
    %52 = vector.shape_cast %51 : vector<8x16x4xf32> to vector<128x4xf32>
    %c5 = arith.constant 5 : index
    %c0_37 = arith.constant 0 : index
    %c0_38 = arith.constant 0 : index
    %53 = vector.load %arg4[%c5, %c0_37, %c0_38] : memref<9x4x128xf32, #tpu.memory_space<vmem>>, vector<1x4x128xf32>
    %54 = vector.shape_cast %53 : vector<1x4x128xf32> to vector<4x128xf32>
    %cst_39 = arith.constant dense<0.000000e+00> : vector<128x128xf32>
    %55 = tpu.matmul %52, %54, %cst_39 {dimension_numbers = #tpu.dot_dimension_numbers<[1], [0], [0], [1], [0, 0, 1, 1], [], []>} : vector<128x4xf32>, vector<4x128xf32>, vector<128x128xf32> -> vector<128x128xf32>
    %56 = arith.addf %47, %55 : vector<128x128xf32>
    %c2_i32 = arith.constant 2 : i32
    %57 = arith.addi %1, %c2_i32 : i32
    %c0_40 = arith.constant 0 : index
    %58 = arith.index_cast %57 : i32 to index
    %c0_41 = arith.constant 0 : index
    %c0_42 = arith.constant 0 : index
    %59 = vector.load %arg3[%c0_40, %58, %c0_41, %c0_42] : memref<1x18x18x4xf32, #tpu.memory_space<vmem>>, vector<1x8x16x4xf32>
    %60 = vector.shape_cast %59 : vector<1x8x16x4xf32> to vector<8x16x4xf32>
    %61 = vector.shape_cast %60 : vector<8x16x4xf32> to vector<128x4xf32>
    %c6 = arith.constant 6 : index
    %c0_43 = arith.constant 0 : index
    %c0_44 = arith.constant 0 : index
    %62 = vector.load %arg4[%c6, %c0_43, %c0_44] : memref<9x4x128xf32, #tpu.memory_space<vmem>>, vector<1x4x128xf32>
    %63 = vector.shape_cast %62 : vector<1x4x128xf32> to vector<4x128xf32>
    %cst_45 = arith.constant dense<0.000000e+00> : vector<128x128xf32>
    %64 = tpu.matmul %61, %63, %cst_45 {dimension_numbers = #tpu.dot_dimension_numbers<[1], [0], [0], [1], [0, 0, 1, 1], [], []>} : vector<128x4xf32>, vector<4x128xf32>, vector<128x128xf32> -> vector<128x128xf32>
    %65 = arith.addf %56, %64 : vector<128x128xf32>
    %c2_i32_46 = arith.constant 2 : i32
    %66 = arith.addi %1, %c2_i32_46 : i32
    %c0_47 = arith.constant 0 : index
    %67 = arith.index_cast %66 : i32 to index
    %c1_48 = arith.constant 1 : index
    %c0_49 = arith.constant 0 : index
    %68 = vector.load %arg3[%c0_47, %67, %c1_48, %c0_49] : memref<1x18x18x4xf32, #tpu.memory_space<vmem>>, vector<1x8x16x4xf32>
    %69 = vector.shape_cast %68 : vector<1x8x16x4xf32> to vector<8x16x4xf32>
    %70 = vector.shape_cast %69 : vector<8x16x4xf32> to vector<128x4xf32>
    %c7 = arith.constant 7 : index
    %c0_50 = arith.constant 0 : index
    %c0_51 = arith.constant 0 : index
    %71 = vector.load %arg4[%c7, %c0_50, %c0_51] : memref<9x4x128xf32, #tpu.memory_space<vmem>>, vector<1x4x128xf32>
    %72 = vector.shape_cast %71 : vector<1x4x128xf32> to vector<4x128xf32>
    %cst_52 = arith.constant dense<0.000000e+00> : vector<128x128xf32>
    %73 = tpu.matmul %70, %72, %cst_52 {dimension_numbers = #tpu.dot_dimension_numbers<[1], [0], [0], [1], [0, 0, 1, 1], [], []>} : vector<128x4xf32>, vector<4x128xf32>, vector<128x128xf32> -> vector<128x128xf32>
    %74 = arith.addf %65, %73 : vector<128x128xf32>
    %c2_i32_53 = arith.constant 2 : i32
    %75 = arith.addi %1, %c2_i32_53 : i32
    %c0_54 = arith.constant 0 : index
    %76 = arith.index_cast %75 : i32 to index
    %c2_55 = arith.constant 2 : index
    %c0_56 = arith.constant 0 : index
    %77 = vector.load %arg3[%c0_54, %76, %c2_55, %c0_56] : memref<1x18x18x4xf32, #tpu.memory_space<vmem>>, vector<1x8x16x4xf32>
    %78 = vector.shape_cast %77 : vector<1x8x16x4xf32> to vector<8x16x4xf32>
    %79 = vector.shape_cast %78 : vector<8x16x4xf32> to vector<128x4xf32>
    %c8 = arith.constant 8 : index
    %c0_57 = arith.constant 0 : index
    %c0_58 = arith.constant 0 : index
    %80 = vector.load %arg4[%c8, %c0_57, %c0_58] : memref<9x4x128xf32, #tpu.memory_space<vmem>>, vector<1x4x128xf32>
    %81 = vector.shape_cast %80 : vector<1x4x128xf32> to vector<4x128xf32>
    %cst_59 = arith.constant dense<0.000000e+00> : vector<128x128xf32>
    %82 = tpu.matmul %79, %81, %cst_59 {dimension_numbers = #tpu.dot_dimension_numbers<[1], [0], [0], [1], [0, 0, 1, 1], [], []>} : vector<128x4xf32>, vector<4x128xf32>, vector<128x128xf32> -> vector<128x128xf32>
    %83 = arith.addf %74, %82 : vector<128x128xf32>
    %c0_60 = arith.constant 0 : index
    %c0_61 = arith.constant 0 : index
    %84 = vector.load %arg5[%c0_60, %c0_61] : memref<1x128xf32, #tpu.memory_space<vmem>>, vector<1x128xf32>
    %85 = vector.broadcast %84 : vector<1x128xf32> to vector<128x128xf32>
    %86 = arith.addf %83, %85 : vector<128x128xf32>
    %87 = arith.negf %86 : vector<128x128xf32>
    %88 = math.exp %87 : vector<128x128xf32>
    %cst_62 = arith.constant 1.000000e+00 : f32
    %89 = vector.broadcast %cst_62 : f32 to vector<128x128xf32>
    %90 = arith.addf %89, %88 : vector<128x128xf32>
    %91 = arith.divf %89, %90 : vector<128x128xf32>
    %92 = arith.mulf %86, %91 : vector<128x128xf32>
    %c0_63 = arith.constant 0 : index
    %c0_64 = arith.constant 0 : index
    %c0_65 = arith.constant 0 : index
    %93 = vector.load %arg6[%c0_63, %c0_64, %c0_65] : memref<1x128x128xf32, #tpu.memory_space<vmem>>, vector<1x128x128xf32>
    %94 = vector.shape_cast %93 : vector<1x128x128xf32> to vector<128x128xf32>
    %95 = vector.shape_cast %92 : vector<128x128xf32> to vector<1x128x128xf32>
    tpu.vector_store %arg6[%c0_63, %c0_64, %c0_65], %95 {strides = array<i32>} : memref<1x128x128xf32, #tpu.memory_space<vmem>>, vector<1x128x128xf32>,
    return
  }
  func.func @transform_0(%arg0: i32, %arg1: i32, %arg2: i32) -> (i32, i32, i32, i32) {
    %c0_i32 = arith.constant 0 : i32
    %c0_i32_0 = arith.constant 0 : i32
    %c0_i32_1 = arith.constant 0 : i32
    %c0_i32_2 = arith.constant 0 : i32
    return %arg0, %c0_i32, %c0_i32_0, %c0_i32_1 : i32, i32, i32, i32
  }
  func.func @transform_1(%arg0: i32, %arg1: i32, %arg2: i32) -> (i32, i32, i32) {
    %c0_i32 = arith.constant 0 : i32
    %c0_i32_0 = arith.constant 0 : i32
    %c0_i32_1 = arith.constant 0 : i32
    return %c0_i32, %c0_i32_0, %arg1 : i32, i32, i32
  }
  func.func @transform_2(%arg0: i32, %arg1: i32, %arg2: i32) -> (i32, i32) {
    %c0_i32 = arith.constant 0 : i32
    %c0_i32_0 = arith.constant 0 : i32
    return %c0_i32, %arg1 : i32, i32
  }
  func.func @transform_3(%arg0: i32, %arg1: i32, %arg2: i32) -> (i32, i32, i32) {
    %c0_i32 = arith.constant 0 : i32
    return %arg0, %arg2, %arg1 : i32, i32, i32
  }
}

</mosaic_0001>

<bundles_post_ra>
// kernel: base_conv_forward.1
= control target key start
LH: loop header
LB: loop body
LE: loop exit
PB: predicated region body
PF: predicated region fallthrough
CT: control target
= control target key end

     0   :  { %s3420_s12 = smov 0   ;;  %s3422_s13 = smov 0   ;;  %s4253_s0 = inlined_call_operand.vmem [shape: f32[2,18,18,4], index: 0, kind: input, shape index: {}]   ;;  %s4254_s1 = inlined_call_operand.vmem [shape: f32[9,4,128], index: 1, kind: input, shape index: {}]   ;;  %s4255_s2 = inlined_call_operand.vmem [shape: f32[1,128], index: 2, kind: input, shape index: {}]   ;;  %s4256_s3 = inlined_call_operand.vmem [shape: f32[2,256,128], index: 3, kind: output, shape index: {}]  }
   0x1   :  { %s3424_s14 = smov 0   ;;  %s3426_s15 = smov 0  }
   0x2   :  { %s3428_s16 = smov 0  }
   0x3 LB: > { %s25_s17 = sadd.s32 1, %s3390_s14  ;;  %s32_s18 = sadd.s32 1, %s3394_s15  ;;  %s3398_s16 = sphi %s3428_s16, %s13_s16   ;;  %s3394_s15 = sphi %s3426_s15, %s4301_s15   ;;  %s3390_s14 = sphi %s3424_s14, %s4300_s14   ;;  %s3386_s13 = sphi %s3422_s13, %s4299_s13   ;;  %s3382_s12 = sphi %s3420_s12, %s4298_s12  }
   0x4   : > { %p26_p0 = scmp.ge.s32.totalorder %s25_s17, 2  ;;  %p2579_p1 = scmp.ge.s32.totalorder %s3398_s16, 1 }
   0x5   : > { %p177_p2 = scmp.lt.s32.totalorder %s3398_s16, 5 }
   0x6   : > { %s4303_s17 = smov (%p26_p0, %s25_s17), 0  ;;  %s4305_s18 = smov (!%p26_p0, %s32_s18), %s3394_s15 }
   0x7   : > { %p178_p3 = pnand %p2579_p1, %p177_p2  ;;  %p34_p4 = scmp.ge.s32.totalorder %s4305_s18, 2 }
   0x9   : > { %s4307_s18 = smov (%p34_p4, %s4305_s18), 0  ;;  %181 = sbr.rel (%p178_p3) target bundleno = 401 (0x191), region = 32 }
   0xe   : > { %v2586_v0 = vld [vmem:[%s4254_s1 + $0x4] sm:$0xf]  ;;  %vm327_vm0 = vcmask 1043456   ;;  %p215_p5 = scmp.lt.s32.totalorder %s3386_s13, 1  ;;  %v259_v1 = vld [vmem:[%s4254_s1] sm:$0xf] }
   0xf   : > { %3253 = vmatprep.subr.msk.mxu1 %vm327_vm0, %v2586_v0  ;;  %3019 = vmatprep.subr.msk.mxu0 %vm327_vm0, %v2586_v0  ;;  %v2621_v2 = vld [vmem:[%s4254_s1 + $0x8] sm:$0xf]  ;;  %s2585_s25 = smul.u32 192, %s3382_s12  ;;  %vm278_vm1 = vcmask 31744   ;;  %v2657_v9 = vld [vmem:[%s4254_s1 + $0xc] sm:$0xf] }
  0x10   : > { %3254 = vmatpush3.msk.msra.mxu1 %vm327_vm0, %v2586_v0  ;;  %3020 = vmatpush3.msk.msra.mxu0 %vm327_vm0, %v2586_v0  ;;  %s4309_s13 = smov (!%p215_p5, %s3386_s13), 1  ;;  %v2691_v10 = vld [vmem:[%s4254_s1 + $0x10] sm:$0xf]  ;;  %v3577_v27 = vld [vmem:[%s4254_s1 + $0x14] sm:$0xf] }
  0x11   : > { %3045 = vmatprep.subr.msk.mxu1 %vm327_vm0, %v259_v1  ;;  %3071 = vmatprep.subr.msk.mxu0 %vm327_vm0, %v2621_v2  ;;  %s3255_s26 = smul.u32 432, %s4309_s13  ;;  %v3582_v28 = vld [vmem:[%s4254_s1 + $0x18] sm:$0xf]  ;;  %v2795_v55 = vld [vmem:[%s4254_s1 + $0x1c] sm:$0xf]  ;;  %s2582_s27 = sshll.u32 %s4309_s13, 5 }
  0x12   : > { %v2829_v56 = vld [vmem:[%s4254_s1 + $0x20] sm:$0xf] }
  0x13   : > { %s219_s29 = scalar_lea.vmem %s4253_s0, %s3255_s26 }
  0x14   : > { %s3474_s30 = scalar_lea.vmem %s219_s29, %s2585_s25  ;;  %s2581_s25 = sshll.u32 %s3382_s12, 4 }
  0x15   : > { %v260_v3 = vld [vmem:[%s3474_s30 + $0x1] sm:$0xff]  ;;  %v261_v5 = vld [vmem:[%s3474_s30 + $0x9] sm:$0xff]  ;;  %v3488_v7 = vld [vmem:[%s3474_s30 + $0x19] sm:$0xff]  ;;  %p4162_p6 = scmp.lt.s32.totalorder %s2581_s25, 31 }
  0x16   : > { %v3478_v4 = vld [vmem:[%s3474_s30 + $0x61] sm:$0xff]  ;;  %3021 = vmatprep.mubr.msk.f32.mxu0 %vm278_vm1, %v260_v3  ;;  %v3485_v6 = vld [vmem:[%s3474_s30 + $0x69] sm:$0xff]  ;;  %v3491_v8 = vld [vmem:[%s3474_s30 + $0x79] sm:$0xff] }
  0x17   : > { %3033 = vmatprep.mubr.msk.f32.mxu1 %vm278_vm1, %v3478_v4  ;;  %3022 = vmatmul.mubr.msk.f32.vlgmr.msra.gmra.mxu0 %vm278_vm1, %v261_v5  ;;  %v3505_v11 = vld [vmem:[%s3474_s30 + $0x21] sm:$0xff]  ;;  %v3515_v13 = vld [vmem:[%s3474_s30 + $0x31] sm:$0xff]  ;;  %v3531_v15 = vld [vmem:[%s3474_s30 + $0x39] sm:$0xff]  ;;  %s4311_s25 = smov (!%p4162_p6, %s2581_s25), 31 }
  0x18   : > { %3034 = vmatmul.mubr.msk.f32.vlgmr.msra.gmra.mxu1 %vm278_vm1, %v3485_v6  ;;  %3072 = vmatpush3.msk.msra.mxu0 %vm327_vm0, %v2621_v2  ;;  %v3508_v12 = vld [vmem:[%s3474_s30 + $0x81] sm:$0xff]  ;;  %v3518_v14 = vld [vmem:[%s3474_s30 + $0x91] sm:$0xff]  ;;  %v3534_v16 = vld [vmem:[%s3474_s30 + $0x99] sm:$0xff]  ;;  %s236_s12 = sadd.s32 %s2582_s27, %s4311_s25 }
  0x19   : > { %3046 = vmatpush3.msk.msra.mxu1 %vm327_vm0, %v259_v1  ;;  %3024 = vmatprep.mubr.msk.f32.mxu0 %vm278_vm1, %v3488_v7  ;;  %v3537_v17 = vld [vmem:[%s3474_s30 + $0x49] sm:$0xff]  ;;  %v3551_v19 = vld [vmem:[%s3474_s30 + $0x51] sm:$0xff]  ;;  %v243_v21 = vld [vmem:[%s3474_s30] sm:$0xff]  ;;  %s2583_s13 = sshll.u32 %s236_s12, 3 }
  0x1a   : > { %3036 = vmatprep.mubr.msk.f32.mxu1 %vm278_vm1, %v3491_v8  ;;  %3097 = vmatprep.subr.msk.mxu1 %vm327_vm0, %v2657_v9  ;;  %v3540_v18 = vld [vmem:[%s3474_s30 + $0xa9] sm:$0xff]  ;;  %v3554_v20 = vld [vmem:[%s3474_s30 + $0xb1] sm:$0xff]  ;;  %v3570_v26 = vld [vmem:[%s3474_s30 + $0x1a] sm:$0xff] }
  0x1b   : > { %3123 = vmatprep.subr.msk.mxu0 %vm327_vm0, %v2691_v10  ;;  %3025 = vmatmul.mubr.msk.f32.gmra.mxu0 %vm278_vm1, %v3505_v11  ;;  %v672_v22 = vld [vmem:[%s3474_s30 + $0x2] sm:$0xff]  ;;  %v673_v24 = vld [vmem:[%s3474_s30 + $0xa] sm:$0xff]  ;;  %v3567_v25 = vld [vmem:[%s3474_s30 + $0x18] sm:$0xff] }
  0x1c   : > { %3037 = vmatmul.mubr.msk.f32.gmra.mxu1 %vm278_vm1, %v3508_v12  ;;  %3027 = vmatprep.mubr.msk.f32.mxu0 %vm278_vm1, %v3515_v13  ;;  %v244_v23 = vld [vmem:[%s3474_s30 + $0x8] sm:$0xff]  ;;  %v246_v29 = vld [vmem:[%s3474_s30 + $0x20] sm:$0xff]  ;;  %v3595_v31 = vld [vmem:[%s3474_s30 + $0x30] sm:$0xff] }
  0x1d   : > { %3039 = vmatprep.mubr.msk.f32.mxu1 %vm278_vm1, %v3518_v14  ;;  %v3588_v30 = vld [vmem:[%s3474_s30 + $0x22] sm:$0xff]  ;;  %v3598_v32 = vld [vmem:[%s3474_s30 + $0x32] sm:$0xff]  ;;  %v3615_v34 = vld [vmem:[%s3474_s30 + $0x3a] sm:$0xff] }
  0x1e   : > { %v3612_v33 = vld [vmem:[%s3474_s30 + $0x38] sm:$0xff]  ;;  %v3618_v35 = vld [vmem:[%s3474_s30 + $0x48] sm:$0xff]  ;;  %v3632_v37 = vld [vmem:[%s3474_s30 + $0x50] sm:$0xff] }
  0x1f   : > { %3028 = vmatmul.mubr.msk.f32.gmra.mxu0 %vm278_vm1, %v3531_v15  ;;  %v3621_v36 = vld [vmem:[%s3474_s30 + $0x4a] sm:$0xff]  ;;  %v3635_v38 = vld [vmem:[%s3474_s30 + $0x52] sm:$0xff]  ;;  %v3638_v39 = vld [vmem:[%s3474_s30 + $0x60] sm:$0xff] }
  0x20   : > { %3040 = vmatmul.mubr.msk.f32.gmra.mxu1 %vm278_vm1, %v3534_v16  ;;  %3030 = vmatprep.mubr.msk.f32.mxu0 %vm278_vm1, %v3537_v17  ;;  %v3641_v40 = vld [vmem:[%s3474_s30 + $0x62] sm:$0xff]  ;;  %v3655_v42 = vld [vmem:[%s3474_s30 + $0x6a] sm:$0xff]  ;;  %v3658_v43 = vld [vmem:[%s3474_s30 + $0x78] sm:$0xff] }
  0x21   : > { %3042 = vmatprep.mubr.msk.f32.mxu1 %vm278_vm1, %v3540_v18  ;;  %v3652_v41 = vld [vmem:[%s3474_s30 + $0x68] sm:$0xff]  ;;  %v3661_v44 = vld [vmem:[%s3474_s30 + $0x7a] sm:$0xff]  ;;  %v3678_v47 = vld [vmem:[%s3474_s30 + $0x90] sm:$0xff] }
  0x22   : > { %v3672_v45 = vld [vmem:[%s3474_s30 + $0x80] sm:$0xff]  ;;  %v3681_v48 = vld [vmem:[%s3474_s30 + $0x92] sm:$0xff]  ;;  %v3698_v51 = vld [vmem:[%s3474_s30 + $0xa8] sm:$0xff] }
  0x23   : > { %3031 = vmatmul.mubr.msk.f32.gmra.mxu0 %vm278_vm1, %v3551_v19  ;;  %v3675_v46 = vld [vmem:[%s3474_s30 + $0x82] sm:$0xff]  ;;  %v3692_v49 = vld [vmem:[%s3474_s30 + $0x98] sm:$0xff]  ;;  %v3701_v52 = vld [vmem:[%s3474_s30 + $0xaa] sm:$0xff] }
  0x24   : > { %3043 = vmatmul.mubr.msk.f32.gmra.mxu1 %vm278_vm1, %v3554_v20  ;;  %3073 = vmatprep.mubr.msk.f32.mxu0 %vm278_vm1, %v672_v22  ;;  %v3695_v50 = vld [vmem:[%s3474_s30 + $0x9a] sm:$0xff]  ;;  %v3712_v53 = vld [vmem:[%s3474_s30 + $0xb0] sm:$0xff]  ;;  %v2656_v59 = vld [vmem:[%s3474_s30 + $0xc8] sm:$0xff] }
  0x25   : > { %3047 = vmatprep.mubr.msk.f32.mxu1 %vm278_vm1, %v243_v21  ;;  %v3715_v54 = vld [vmem:[%s3474_s30 + $0xb2] sm:$0xff]  ;;  %v2655_v57 = vld [vmem:[%s3474_s30 + $0xc0] sm:$0xff]  ;;  %v3797_v60 = vld [vmem:[%s3474_s30 + $0xc9] sm:$0xff] }
  0x26   : > { %v3786_v58 = vld [vmem:[%s3474_s30 + $0xc1] sm:$0xff]  ;;  %v2759_v62 = vld [vmem:[%s3474_s30 + $0xd8] sm:$0xff]  ;;  %v2724_v63 = vld [vmem:[%s3474_s30 + $0xca] sm:$0xff] }
  0x27   : > { %3074 = vmatmul.mubr.msk.f32.vlgmr.msra.gmra.mxu0 %vm278_vm1, %v673_v24  ;;  %v2723_v61 = vld [vmem:[%s3474_s30 + $0xc2] sm:$0xff]  ;;  %v2793_v1 = vld [vmem:[%s3474_s30 + $0xd9] sm:$0xff] }
  0x28   : > { %3048 = vmatmul.mubr.msk.f32.vlgmr.msra.gmra.mxu1 %vm278_vm1, %v244_v23  ;;  %3124 = vmatpush3.msk.msra.mxu0 %vm327_vm0, %v2691_v10  ;;  %v2760_v0 = vld [vmem:[%s3474_s30 + $0xe0] sm:$0xff] }
  0x29   : > { %3098 = vmatpush3.msk.msra.mxu1 %vm327_vm0, %v2657_v9  ;;  %3050 = vmatprep.mubr.msk.f32.mxu1 %vm278_vm1, %v3567_v25  ;;  %v2827_v2 = vld [vmem:[%s3474_s30 + $0xda] sm:$0xff] }
  0x2a   : > { %3076 = vmatprep.mubr.msk.f32.mxu0 %vm278_vm1, %v3570_v26  ;;  %3149 = vmatprep.subr.msk.mxu1 %vm327_vm0, %v3577_v27  ;;  %v2794_v3 = vld [vmem:[%s3474_s30 + $0xe1] sm:$0xff] }
  0x2b   : > { %3175 = vmatprep.subr.msk.mxu0 %vm327_vm0, %v3582_v28  ;;  %3077 = vmatmul.mubr.msk.f32.gmra.mxu0 %vm278_vm1, %v3588_v30 }
  0x2c   : > { %3051 = vmatmul.mubr.msk.f32.gmra.mxu1 %vm278_vm1, %v246_v29  ;;  %3079 = vmatprep.mubr.msk.f32.mxu0 %vm278_vm1, %v3598_v32 }
  0x2d   : > { %3053 = vmatprep.mubr.msk.f32.mxu1 %vm278_vm1, %v3595_v31 }
  0x2f   : > { %3080 = vmatmul.mubr.msk.f32.gmra.mxu0 %vm278_vm1, %v3615_v34 }
  0x30   : > { %3054 = vmatmul.mubr.msk.f32.gmra.mxu1 %vm278_vm1, %v3612_v33  ;;  %3082 = vmatprep.mubr.msk.f32.mxu0 %vm278_vm1, %v3621_v36 }
  0x31   : > { %3056 = vmatprep.mubr.msk.f32.mxu1 %vm278_vm1, %v3618_v35 }
  0x33   : > { %3083 = vmatmul.mubr.msk.f32.gmra.mxu0 %vm278_vm1, %v3635_v38 }
  0x34   : > { %3057 = vmatmul.mubr.msk.f32.gmra.mxu1 %vm278_vm1, %v3632_v37  ;;  %3085 = vmatprep.mubr.msk.f32.mxu0 %vm278_vm1, %v3641_v40 }
  0x35   : > { %3059 = vmatprep.mubr.msk.f32.mxu1 %vm278_vm1, %v3638_v39 }
  0x37   : > { %3086 = vmatmul.mubr.msk.f32.gmra.mxu0 %vm278_vm1, %v3655_v42 }
  0x38   : > { %3060 = vmatmul.mubr.msk.f32.gmra.mxu1 %vm278_vm1, %v3652_v41  ;;  %3088 = vmatprep.mubr.msk.f32.mxu0 %vm278_vm1, %v3661_v44 }
  0x39   : > { %3062 = vmatprep.mubr.msk.f32.mxu1 %vm278_vm1, %v3658_v43 }
  0x3b   : > { %3089 = vmatmul.mubr.msk.f32.gmra.mxu0 %vm278_vm1, %v3675_v46 }
  0x3c   : > { %3063 = vmatmul.mubr.msk.f32.gmra.mxu1 %vm278_vm1, %v3672_v45  ;;  %3091 = vmatprep.mubr.msk.f32.mxu0 %vm278_vm1, %v3681_v48 }
  0x3d   : > { %3065 = vmatprep.mubr.msk.f32.mxu1 %vm278_vm1, %v3678_v47 }
  0x3f   : > { %3092 = vmatmul.mubr.msk.f32.gmra.mxu0 %vm278_vm1, %v3695_v50 }
  0x40   : > { %3066 = vmatmul.mubr.msk.f32.gmra.mxu1 %vm278_vm1, %v3692_v49  ;;  %3094 = vmatprep.mubr.msk.f32.mxu0 %vm278_vm1, %v3701_v52 }
  0x41   : > { %3068 = vmatprep.mubr.msk.f32.mxu1 %vm278_vm1, %v3698_v51 }
  0x43   : > { %3095 = vmatmul.mubr.msk.f32.gmra.mxu0 %vm278_vm1, %v3715_v54 }
  0x44   : > { %3069 = vmatmul.mubr.msk.f32.gmra.mxu1 %vm278_vm1, %v3712_v53  ;;  %3125 = vmatprep.mubr.msk.f32.mxu0 %vm278_vm1, %v3488_v7 }
  0x45   : > { %3099 = vmatprep.mubr.msk.f32.mxu1 %vm278_vm1, %v3567_v25 }
  0x47   : > { %3126 = vmatmul.mubr.msk.f32.vlgmr.msra.gmra.mxu0 %vm278_vm1, %v3505_v11 }
  0x48   : > { %3100 = vmatmul.mubr.msk.f32.vlgmr.msra.gmra.mxu1 %vm278_vm1, %v246_v29  ;;  %3176 = vmatpush3.msk.msra.mxu0 %vm327_vm0, %v3582_v28 }
  0x49   : > { %3150 = vmatpush3.msk.msra.mxu1 %vm327_vm0, %v3577_v27  ;;  %3102 = vmatprep.mubr.msk.f32.mxu1 %vm278_vm1, %v3595_v31 }
  0x4a   : > { %3128 = vmatprep.mubr.msk.f32.mxu0 %vm278_vm1, %v3515_v13  ;;  %3201 = vmatprep.subr.msk.mxu1 %vm327_vm0, %v2795_v55 }
  0x4b   : > { %3227 = vmatprep.subr.msk.mxu0 %vm327_vm0, %v2829_v56  ;;  %3129 = vmatmul.mubr.msk.f32.gmra.mxu0 %vm278_vm1, %v3531_v15 }
  0x4c   : > { %3103 = vmatmul.mubr.msk.f32.gmra.mxu1 %vm278_vm1, %v3612_v33  ;;  %3131 = vmatprep.mubr.msk.f32.mxu0 %vm278_vm1, %v3537_v17 }
  0x4d   : > { %3105 = vmatprep.mubr.msk.f32.mxu1 %vm278_vm1, %v3618_v35 }
  0x4f   : > { %3132 = vmatmul.mubr.msk.f32.gmra.mxu0 %vm278_vm1, %v3551_v19 }
  0x50   : > { %3106 = vmatmul.mubr.msk.f32.gmra.mxu1 %vm278_vm1, %v3632_v37  ;;  %3134 = vmatprep.mubr.msk.f32.mxu0 %vm278_vm1, %v3478_v4 }
  0x51   : > { %3108 = vmatprep.mubr.msk.f32.mxu1 %vm278_vm1, %v3638_v39 }
  0x53   : > { %3135 = vmatmul.mubr.msk.f32.gmra.mxu0 %vm278_vm1, %v3485_v6 }
  0x54   : > { %3109 = vmatmul.mubr.msk.f32.gmra.mxu1 %vm278_vm1, %v3652_v41  ;;  %3137 = vmatprep.mubr.msk.f32.mxu0 %vm278_vm1, %v3491_v8 }
  0x55   : > { %3111 = vmatprep.mubr.msk.f32.mxu1 %vm278_vm1, %v3658_v43 }
  0x57   : > { %3138 = vmatmul.mubr.msk.f32.gmra.mxu0 %vm278_vm1, %v3508_v12 }
  0x58   : > { %3112 = vmatmul.mubr.msk.f32.gmra.mxu1 %vm278_vm1, %v3672_v45  ;;  %3140 = vmatprep.mubr.msk.f32.mxu0 %vm278_vm1, %v3518_v14 }
  0x59   : > { %3114 = vmatprep.mubr.msk.f32.mxu1 %vm278_vm1, %v3678_v47 }
  0x5b   : > { %3141 = vmatmul.mubr.msk.f32.gmra.mxu0 %vm278_vm1, %v3534_v16 }
  0x5c   : > { %3115 = vmatmul.mubr.msk.f32.gmra.mxu1 %vm278_vm1, %v3692_v49  ;;  %3143 = vmatprep.mubr.msk.f32.mxu0 %vm278_vm1, %v3540_v18 }
  0x5d   : > { %3117 = vmatprep.mubr.msk.f32.mxu1 %vm278_vm1, %v3698_v51 }
  0x5f   : > { %3144 = vmatmul.mubr.msk.f32.gmra.mxu0 %vm278_vm1, %v3554_v20 }
  0x60   : > { %3118 = vmatmul.mubr.msk.f32.gmra.mxu1 %vm278_vm1, %v3712_v53  ;;  %3146 = vmatprep.mubr.msk.f32.mxu0 %vm278_vm1, %v3786_v58 }
  0x61   : > { %3120 = vmatprep.mubr.msk.f32.mxu1 %vm278_vm1, %v2655_v57 }
  0x63   : > { %3147 = vmatmul.mubr.msk.f32.gmra.mxu0 %vm278_vm1, %v3797_v60 }
  0x64   : > { %3121 = vmatmul.mubr.msk.f32.gmra.mxu1 %vm278_vm1, %v2656_v59  ;;  %3177 = vmatprep.mubr.msk.f32.mxu0 %vm278_vm1, %v3595_v31 }
  0x65   : > { %3151 = vmatprep.mubr.msk.f32.mxu1 %vm278_vm1, %v3570_v26 }
  0x67   : > { %3178 = vmatmul.mubr.msk.f32.vlgmr.msra.gmra.mxu0 %vm278_vm1, %v3612_v33 }
  0x68   : > { %3152 = vmatmul.mubr.msk.f32.vlgmr.msra.gmra.mxu1 %vm278_vm1, %v3588_v30  ;;  %3228 = vmatpush3.msk.msra.mxu0 %vm327_vm0, %v2829_v56 }
  0x69   : > { %3202 = vmatpush3.msk.msra.mxu1 %vm327_vm0, %v2795_v55  ;;  %3154 = vmatprep.mubr.msk.f32.mxu1 %vm278_vm1, %v3598_v32 }
  0x6a   : > { %3180 = vmatprep.mubr.msk.f32.mxu0 %vm278_vm1, %v3618_v35 }
  0x6b   : > { %3181 = vmatmul.mubr.msk.f32.gmra.mxu0 %vm278_vm1, %v3632_v37 }
  0x6c   : > { %3155 = vmatmul.mubr.msk.f32.gmra.mxu1 %vm278_vm1, %v3615_v34  ;;  %3183 = vmatprep.mubr.msk.f32.mxu0 %vm278_vm1, %v3638_v39 }
  0x6d   : > { %3157 = vmatprep.mubr.msk.f32.mxu1 %vm278_vm1, %v3621_v36 }
  0x6f   : > { %3184 = vmatmul.mubr.msk.f32.gmra.mxu0 %vm278_vm1, %v3652_v41 }
  0x70   : > { %3158 = vmatmul.mubr.msk.f32.gmra.mxu1 %vm278_vm1, %v3635_v38  ;;  %3186 = vmatprep.mubr.msk.f32.mxu0 %vm278_vm1, %v3658_v43 }
  0x71   : > { %3160 = vmatprep.mubr.msk.f32.mxu1 %vm278_vm1, %v3641_v40 }
  0x73   : > { %3187 = vmatmul.mubr.msk.f32.gmra.mxu0 %vm278_vm1, %v3672_v45 }
  0x74   : > { %3161 = vmatmul.mubr.msk.f32.gmra.mxu1 %vm278_vm1, %v3655_v42  ;;  %3189 = vmatprep.mubr.msk.f32.mxu0 %vm278_vm1, %v3678_v47 }
  0x75   : > { %3163 = vmatprep.mubr.msk.f32.mxu1 %vm278_vm1, %v3661_v44 }
  0x77   : > { %3190 = vmatmul.mubr.msk.f32.gmra.mxu0 %vm278_vm1, %v3692_v49 }
  0x78   : > { %3164 = vmatmul.mubr.msk.f32.gmra.mxu1 %vm278_vm1, %v3675_v46  ;;  %3192 = vmatprep.mubr.msk.f32.mxu0 %vm278_vm1, %v3698_v51 }
  0x79   : > { %3166 = vmatprep.mubr.msk.f32.mxu1 %vm278_vm1, %v3681_v48 }
  0x7b   : > { %3193 = vmatmul.mubr.msk.f32.gmra.mxu0 %vm278_vm1, %v3712_v53 }
  0x7c   : > { %3167 = vmatmul.mubr.msk.f32.gmra.mxu1 %vm278_vm1, %v3695_v50  ;;  %3195 = vmatprep.mubr.msk.f32.mxu0 %vm278_vm1, %v2655_v57 }
  0x7d   : > { %3169 = vmatprep.mubr.msk.f32.mxu1 %vm278_vm1, %v3701_v52 }
  0x7f   : > { %3196 = vmatmul.mubr.msk.f32.gmra.mxu0 %vm278_vm1, %v2656_v59 }
  0x80   : > { %3170 = vmatmul.mubr.msk.f32.gmra.mxu1 %vm278_vm1, %v3715_v54  ;;  %3198 = vmatprep.mubr.msk.f32.mxu0 %vm278_vm1, %v2759_v62 }
  0x81   : > { %3172 = vmatprep.mubr.msk.f32.mxu1 %vm278_vm1, %v2723_v61 }
  0x83   : > { %3199 = vmatmul.mubr.msk.f32.gmra.mxu0 %vm278_vm1, %v2760_v0 }
  0x84   : > { %3173 = vmatmul.mubr.msk.f32.gmra.mxu1 %vm278_vm1, %v2724_v63  ;;  %3229 = vmatprep.mubr.msk.f32.mxu0 %vm278_vm1, %v3598_v32 }
  0x85   : > { %3203 = vmatprep.mubr.msk.f32.mxu1 %vm278_vm1, %v3515_v13 }
  0x87   : > { %3230 = vmatmul.mubr.msk.f32.vlgmr.msra.gmra.mxu0 %vm278_vm1, %v3615_v34 }
  0x88   : > { %3204 = vmatmul.mubr.msk.f32.vlgmr.msra.gmra.mxu1 %vm278_vm1, %v3531_v15  ;;  %3232 = vmatprep.mubr.msk.f32.mxu0 %vm278_vm1, %v3621_v36 }
  0x89   : > { %3206 = vmatprep.mubr.msk.f32.mxu1 %vm278_vm1, %v3537_v17 }
  0x8b   : > { %3233 = vmatmul.mubr.msk.f32.gmra.mxu0 %vm278_vm1, %v3635_v38 }
  0x8c   : > { %3207 = vmatmul.mubr.msk.f32.gmra.mxu1 %vm278_vm1, %v3551_v19  ;;  %3235 = vmatprep.mubr.msk.f32.mxu0 %vm278_vm1, %v3641_v40 }
  0x8d   : > { %3209 = vmatprep.mubr.msk.f32.mxu1 %vm278_vm1, %v3478_v4  ;;  %v2828_v4 = vld [vmem:[%s3474_s30 + $0xe2] sm:$0xff]  ;;  %s4204_s30 = scalar_lea.vmem %s4256_s3, %s2583_s13 }
  0x8f   : > { %3236 = vmatmul.mubr.msk.f32.gmra.mxu0 %vm278_vm1, %v3655_v42 }
  0x90   : > { %3210 = vmatmul.mubr.msk.f32.gmra.mxu1 %vm278_vm1, %v3485_v6  ;;  %3238 = vmatprep.mubr.msk.f32.mxu0 %vm278_vm1, %v3661_v44 }
  0x91   : > { %3212 = vmatprep.mubr.msk.f32.mxu1 %vm278_vm1, %v3491_v8 }
  0x93   : > { %3239 = vmatmul.mubr.msk.f32.gmra.mxu0 %vm278_vm1, %v3675_v46 }
  0x94   : > { %3213 = vmatmul.mubr.msk.f32.gmra.mxu1 %vm278_vm1, %v3508_v12  ;;  %3241 = vmatprep.mubr.msk.f32.mxu0 %vm278_vm1, %v3681_v48 }
  0x95   : > { %3215 = vmatprep.mubr.msk.f32.mxu1 %vm278_vm1, %v3518_v14 }
  0x97   : > { %3242 = vmatmul.mubr.msk.f32.gmra.mxu0 %vm278_vm1, %v3695_v50 }
  0x98   : > { %3216 = vmatmul.mubr.msk.f32.gmra.mxu1 %vm278_vm1, %v3534_v16  ;;  %3244 = vmatprep.mubr.msk.f32.mxu0 %vm278_vm1, %v3701_v52 }
  0x99   : > { %3218 = vmatprep.mubr.msk.f32.mxu1 %vm278_vm1, %v3540_v18 }
  0x9b   : > { %3245 = vmatmul.mubr.msk.f32.gmra.mxu0 %vm278_vm1, %v3715_v54 }
  0x9c   : > { %3219 = vmatmul.mubr.msk.f32.gmra.mxu1 %vm278_vm1, %v3554_v20  ;;  %3247 = vmatprep.mubr.msk.f32.mxu0 %vm278_vm1, %v2723_v61 }
  0x9d   : > { %3221 = vmatprep.mubr.msk.f32.mxu1 %vm278_vm1, %v3786_v58 }
  0x9f   : > { %3248 = vmatmul.mubr.msk.f32.gmra.mxu0 %vm278_vm1, %v2724_v63 }
  0xa0   : > { %3222 = vmatmul.mubr.msk.f32.gmra.mxu1 %vm278_vm1, %v3797_v60  ;;  %3250 = vmatprep.mubr.msk.f32.mxu0 %vm278_vm1, %v2827_v2 }
  0xa1   : > { %3224 = vmatprep.mubr.msk.f32.mxu1 %vm278_vm1, %v2793_v1 }
  0xa3   : > { %3251 = vmatmul.mubr.msk.f32.gmra.mxu0 %vm278_vm1, %v2828_v4 }
  0xa4   : > { %3225 = vmatmul.mubr.msk.f32.gmra.mxu1 %vm278_vm1, %v2794_v3 }
  0xd7   : > { %v3023_v5 = vpop.f32.mrf.mxu0 }
  0xd8   : > { %v3035_v6 = vpop.f32.mrf.mxu1 }
  0xd9   : > { %v397_v7 = vpop.f32.mrf.mxu0 }
  0xda   : > { %v437_v8 = vpop.f32.mrf.mxu1 }
  0xdb   : > { %v3026_v9 = vpop.f32.mrf.mxu0 }
  0xdc   : > { %v3038_v10 = vpop.f32.mrf.mxu1 }
  0xdd   : > { %v407_v11 = vpop.f32.mrf.mxu0 }
  0xde   : > { %v447_v12 = vpop.f32.mrf.mxu1 }
  0xdf   : > { %v3029_v13 = vpop.f32.mrf.mxu0 }
  0xe0   : > { %v3041_v14 = vpop.f32.mrf.mxu1 }
  0xe1   : > { %v417_v15 = vpop.f32.mrf.mxu0 }
  0xe2   : > { %v457_v16 = vpop.f32.mrf.mxu1 }
  0xe3   : > { %v3032_v17 = vpop.f32.mrf.mxu0 }
  0xe4   : > { %v3044_v18 = vpop.f32.mrf.mxu1 }
  0xe5   : > { %v427_v19 = vpop.f32.mrf.mxu0 }
  0xe6   : > { %v3928_v20 = vpop.f32.mrf.mxu1 }
  0xe7   : > { %v3075_v22 = vpop.f32.mrf.mxu0 }
  0xe8   : > { %v3049_v21 = vpop.f32.mrf.mxu1 }
  0xe9   : > { %v599_v23 = vadd.f32 %v3049_v21, %v3023_v5  ;;  %v807_v25 = vpop.f32.mrf.mxu0 }
  0xea   : > { %v593_v24 = vpop.f32.mrf.mxu1 }
  0xeb   : > { %v3930_v26 = vadd.f32 %v3075_v22, %v599_v23  ;;  %v594_v27 = vadd.f32 %v593_v24, %v397_v7  ;;  %v3078_v29 = vpop.f32.mrf.mxu0 }
  0xec   : > { %v3052_v28 = vpop.f32.mrf.mxu1 }
  0xed   : > { %v3932_v30 = vadd.f32 %v807_v25, %v594_v27  ;;  %v609_v31 = vadd.f32 %v3052_v28, %v3026_v9  ;;  %v817_v33 = vpop.f32.mrf.mxu0 }
  0xee   : > { %v603_v32 = vpop.f32.mrf.mxu1 }
  0xef   : > { %v3934_v34 = vadd.f32 %v3078_v29, %v609_v31  ;;  %v604_v35 = vadd.f32 %v603_v32, %v407_v11  ;;  %v3081_v37 = vpop.f32.mrf.mxu0 }
  0xf0   : > { %v3055_v36 = vpop.f32.mrf.mxu1 }
  0xf1   : > { %v3936_v38 = vadd.f32 %v817_v33, %v604_v35  ;;  %v619_v39 = vadd.f32 %v3055_v36, %v3029_v13  ;;  %v827_v41 = vpop.f32.mrf.mxu0 }
  0xf2   : > { %v613_v40 = vpop.f32.mrf.mxu1 }
  0xf3   : > { %v3938_v42 = vadd.f32 %v3081_v37, %v619_v39  ;;  %v614_v43 = vadd.f32 %v613_v40, %v417_v15  ;;  %v3084_v45 = vpop.f32.mrf.mxu0 }
  0xf4   : > { %v3058_v44 = vpop.f32.mrf.mxu1 }
  0xf5   : > { %v3940_v46 = vadd.f32 %v827_v41, %v614_v43  ;;  %v629_v47 = vadd.f32 %v3058_v44, %v3032_v17  ;;  %v837_v49 = vpop.f32.mrf.mxu0 }
  0xf6   : > { %v623_v48 = vpop.f32.mrf.mxu1 }
  0xf7   : > { %v3942_v50 = vadd.f32 %v3084_v45, %v629_v47  ;;  %v624_v51 = vadd.f32 %v623_v48, %v427_v19  ;;  %v3087_v53 = vpop.f32.mrf.mxu0 }
  0xf8   : > { %v3061_v52 = vpop.f32.mrf.mxu1 }
  0xf9   : > { %v3944_v54 = vadd.f32 %v837_v49, %v624_v51  ;;  %v639_v55 = vadd.f32 %v3061_v52, %v3035_v6  ;;  %v847_v57 = vpop.f32.mrf.mxu0 }
  0xfa   : > { %v633_v56 = vpop.f32.mrf.mxu1 }
  0xfb   : > { %v3946_v58 = vadd.f32 %v3087_v53, %v639_v55  ;;  %v634_v59 = vadd.f32 %v633_v56, %v437_v8  ;;  %v3090_v61 = vpop.f32.mrf.mxu0 }
  0xfc   : > { %v3064_v60 = vpop.f32.mrf.mxu1 }
  0xfd   : > { %v3948_v62 = vadd.f32 %v847_v57, %v634_v59  ;;  %v649_v63 = vadd.f32 %v3064_v60, %v3038_v10  ;;  %v857_v1 = vpop.f32.mrf.mxu0 }
  0xfe   : > { %v643_v0 = vpop.f32.mrf.mxu1 }
  0xff   : > { %v3950_v2 = vadd.f32 %v3090_v61, %v649_v63  ;;  %v644_v3 = vadd.f32 %v643_v0, %v447_v12  ;;  %v3093_v5 = vpop.f32.mrf.mxu0 }
 0x100   : > { %v3067_v4 = vpop.f32.mrf.mxu1 }
 0x101   : > { %v3952_v7 = vadd.f32 %v857_v1, %v644_v3  ;;  %v659_v6 = vadd.f32 %v3067_v4, %v3041_v14  ;;  %v867_v11 = vpop.f32.mrf.mxu0 }
 0x102   : > { %v653_v9 = vpop.f32.mrf.mxu1 }
 0x103   : > { %v3954_v13 = vadd.f32 %v3093_v5, %v659_v6  ;;  %v654_v8 = vadd.f32 %v653_v9, %v457_v16  ;;  %v3096_v17 = vpop.f32.mrf.mxu0 }
 0x104   : > { %v3070_v15 = vpop.f32.mrf.mxu1 }
 0x105   : > { %v3956_v19 = vadd.f32 %v867_v11, %v654_v8  ;;  %v669_v10 = vadd.f32 %v3070_v15, %v3044_v18  ;;  %v877_v22 = vpop.f32.mrf.mxu0 }
 0x106   : > { %v663_v21 = vpop.f32.mrf.mxu1 }
 0x107   : > { %v3958_v23 = vadd.f32 %v3096_v17, %v669_v10  ;;  %v664_v12 = vadd.f32 %v663_v21, %v3928_v20  ;;  %v3127_v25 = vpop.f32.mrf.mxu0 }
 0x108   : > { %v3101_v24 = vpop.f32.mrf.mxu1 }
 0x109   : > { %4257 = vst [vmem:[#allocation2_spill] sm:$0xff] %v3958_v23  ;;  %v3961_v27 = vadd.f32 %v877_v22, %v664_v12  ;;  %v1270_v28 = vpop.f32.mrf.mxu0 }
 0x10a   : > { %v1040_v14 = vpop.f32.mrf.mxu1 }
 0x10b   : > { %4258 = vst [vmem:[#allocation3_spill] sm:$0xff] %v3961_v27  ;;  %v3963_v31 = vpop.f32.mrf.mxu0 }
 0x10c   : > { %v3104_v29 = vpop.f32.mrf.mxu1 }
 0x10d   : > { %v3965_v32 = vpop.f32.mrf.mxu0 }
 0x10e   : > { %v1050_v16 = vpop.f32.mrf.mxu1 }
 0x10f   : > { %v3967_v18 = vpop.f32.mrf.mxu0 }
 0x110   : > { %v3107_v33 = vpop.f32.mrf.mxu1 }
 0x111   : > { %v3969_v36 = vpop.f32.mrf.mxu0 }
 0x112   : > { %v1060_v35 = vpop.f32.mrf.mxu1 }
 0x113   : > { %v3973_v20 = vpop.f32.mrf.mxu0 }
 0x114   : > { %v3971_v37 = vpop.f32.mrf.mxu1 }
 0x115   : > { %v3977_v40 = vpop.f32.mrf.mxu0 }
 0x116   : > { %v3975_v39 = vpop.f32.mrf.mxu1 }
 0x117   : > { %v3981_v43 = vpop.f32.mrf.mxu0 }
 0x118   : > { %v3979_v41 = vpop.f32.mrf.mxu1 }
 0x119   : > { %v3985_v45 = vpop.f32.mrf.mxu0 }
 0x11a   : > { %v3983_v44 = vpop.f32.mrf.mxu1 }
 0x11b   : > { %v3989_v48 = vpop.f32.mrf.mxu0 }
 0x11c   : > { %v3987_v47 = vpop.f32.mrf.mxu1 }
 0x11d   : > { %v3993_v51 = vpop.f32.mrf.mxu0 }
 0x11e   : > { %v3991_v49 = vpop.f32.mrf.mxu1 }
 0x11f   : > { %v3997_v53 = vpop.f32.mrf.mxu0 }
 0x120   : > { %v3995_v52 = vpop.f32.mrf.mxu1  ;;  %4259 = vst [vmem:[#allocation4_spill] sm:$0xff] %v3997_v53 }
 0x121   : > { %v4001_v56 = vpop.f32.mrf.mxu0 }
 0x122   : > { %v3999_v55 = vpop.f32.mrf.mxu1  ;;  %4261 = vst [vmem:[#allocation6_spill] sm:$0xff] %v4001_v56  ;;  %v1120_v56 = vadd.f32 %v3101_v24, %v3930_v26  ;;  %v1121_v26 = vadd.f32 %v1050_v16, %v3936_v38  ;;  %v1126_v38 = vadd.f32 %v3971_v37, %v3942_v50  ;;  %v1127_v50 = vadd.f32 %v3983_v44, %v3948_v62 }
 0x123   : > { %4260 = vst [vmem:[#allocation5_spill] sm:$0xff] %v3999_v55  ;;  %v4005_v59 = vpop.f32.mrf.mxu0  ;;  %v1130_v37 = vadd.f32 %v3987_v47, %v3950_v2 }
 0x124   : > { %v4003_v57 = vpop.f32.mrf.mxu1  ;;  %4263 = vst [vmem:[#allocation8_spill] sm:$0xff] %v4005_v59 }
 0x125   : > { %4262 = vst [vmem:[#allocation7_spill] sm:$0xff] %v4003_v57  ;;  %v4009_v61 = vpop.f32.mrf.mxu0 }
 0x126   : > { %v4007_v60 = vpop.f32.mrf.mxu1  ;;  %4265 = vst [vmem:[#allocation10_spill] sm:$0xff] %v4009_v61 }
 0x127   : > { %4264 = vst [vmem:[#allocation9_spill] sm:$0xff] %v4007_v60  ;;  %v3179_v0 = vpop.f32.mrf.mxu0 }
 0x128   : > { %v3153_v63 = vpop.f32.mrf.mxu1 }
 0x129   : > { %v1733_v3 = vpop.f32.mrf.mxu0 }
 0x12a   : > { %v1500_v1 = vpop.f32.mrf.mxu1 }
 0x12b   : > { %v3182_v5 = vpop.f32.mrf.mxu0 }
 0x12c   : > { %v3156_v4 = vpop.f32.mrf.mxu1 }
 0x12d   : > { %v4011_v9 = vpop.f32.mrf.mxu0 }
 0x12e   : > { %v1510_v6 = vpop.f32.mrf.mxu1 }
 0x12f   : > { %v4013_v8 = vpop.f32.mrf.mxu0 }
 0x130   : > { %v3159_v11 = vpop.f32.mrf.mxu1 }
 0x131   : > { %v4015_v17 = vpop.f32.mrf.mxu0 }
 0x132   : > { %v1520_v15 = vpop.f32.mrf.mxu1 }
 0x133   : > { %v4019_v21 = vpop.f32.mrf.mxu0 }
 0x134   : > { %v4017_v10 = vpop.f32.mrf.mxu1  ;;  %4266 = vst [vmem:[#allocation11_spill] sm:$0xff] %v4019_v21 }
 0x135   : > { %v4023_v12 = vpop.f32.mrf.mxu0 }
 0x136   : > { %v4021_v22 = vpop.f32.mrf.mxu1  ;;  %4267 = vst [vmem:[#allocation12_spill] sm:$0xff] %v4023_v12  ;;  %v1119_v12 = vadd.f32 %v1040_v14, %v3932_v30  ;;  %v1124_v14 = vadd.f32 %v3107_v33, %v3938_v42  ;;  %v1128_v42 = vadd.f32 %v3979_v41, %v3946_v58  ;;  %v4082_v58 = vld [vmem:[%s4255_s2] ss:$0 sm:$0xff]  ;;  %v1356_v41 = vadd.f32 %v3973_v20, %v1126_v38  ;;  %v4277_v38 = vld [vmem:[#allocation5_spill] sm:$0xff] }
 0x137   : > { %v4027_v59 = vpop.f32.mrf.mxu0  ;;  %v1357_v20 = vadd.f32 %v3985_v45, %v1127_v50 }
 0x138   : > { %v4025_v61 = vpop.f32.mrf.mxu1  ;;  %4269 = vst [vmem:[#allocation14_spill] sm:$0xff] %v4027_v59  ;;  %v1350_v59 = vadd.f32 %v3127_v25, %v1120_v56  ;;  %v1123_v25 = vadd.f32 %v1060_v35, %v3940_v46  ;;  %v1354_v46 = vadd.f32 %v3967_v18, %v1124_v14  ;;  %v1358_v44 = vadd.f32 %v3981_v43, %v1128_v42 }
 0x139   : > { %4268 = vst [vmem:[#allocation13_spill] sm:$0xff] %v4025_v61  ;;  %v4031_v27 = vpop.f32.mrf.mxu0 }
 0x13a   : > { %v4029_v60 = vpop.f32.mrf.mxu1  ;;  %4271 = vst [vmem:[#allocation16_spill] sm:$0xff] %v4031_v27  ;;  %v1580_v24 = vadd.f32 %v3153_v63, %v1350_v59  ;;  %v1125_v59 = vadd.f32 %v3975_v39, %v3944_v54  ;;  %v1129_v54 = vadd.f32 %v3991_v49, %v3952_v7  ;;  %v1584_v2 = vadd.f32 %v3159_v11, %v1354_v46  ;;  %v4280_v46 = vld [vmem:[#allocation4_spill] sm:$0xff] }
 0x13b   : > { %4270 = vst [vmem:[#allocation15_spill] sm:$0xff] %v4029_v60  ;;  %v4035_v23 = vpop.f32.mrf.mxu0  ;;  %v1122_v60 = vadd.f32 %v3104_v29, %v3934_v34 }
 0x13c   : > { %v4033_v57 = vpop.f32.mrf.mxu1  ;;  %4273 = vst [vmem:[#allocation18_spill] sm:$0xff] %v4035_v23  ;;  %v1349_v23 = vadd.f32 %v1270_v28, %v1119_v12  ;;  %v1351_v28 = vadd.f32 %v3965_v32, %v1121_v26  ;;  %v1813_v16 = vadd.f32 %v3179_v0, %v1580_v24  ;;  %v1353_v32 = vadd.f32 %v3969_v36, %v1123_v25 }
 0x13d   : > { %4272 = vst [vmem:[#allocation17_spill] sm:$0xff] %v4033_v57  ;;  %v4040_v21 = vpop.f32.mrf.mxu0  ;;  %v1352_v30 = vadd.f32 %v3963_v31, %v1122_v60  ;;  %v1355_v62 = vadd.f32 %v3977_v40, %v1125_v59  ;;  %v1586_v40 = vadd.f32 %v4017_v10, %v1356_v41  ;;  %v1132_v24 = vadd.f32 %v3995_v52, %v3954_v13 }
 0x13e   : > { %v4038_v53 = vpop.f32.mrf.mxu1  ;;  %4275 = vst [vmem:[#allocation20_spill] sm:$0xff] %v4040_v21  ;;  %v1581_v35 = vadd.f32 %v1510_v6, %v1351_v28  ;;  %v1583_v47 = vadd.f32 %v1520_v15, %v1353_v32  ;;  %v1359_v6 = vadd.f32 %v3993_v51, %v1129_v54  ;;  %v1817_v45 = vadd.f32 %v4013_v8, %v1584_v2 }
 0x13f   : > { %4274 = vst [vmem:[#allocation19_spill] sm:$0xff] %v4038_v53  ;;  %v4045_v61 = vpop.f32.mrf.mxu0  ;;  %v1582_v56 = vadd.f32 %v3156_v4, %v1352_v30  ;;  %v1585_v51 = vadd.f32 %v4021_v22, %v1355_v62 }
 0x140   : > { %v4043_v55 = vpop.f32.mrf.mxu1  ;;  %4276 = vst [vmem:[#allocation21_spill] sm:$0xff] %v4045_v61  ;;  %v1579_v61 = vadd.f32 %v1500_v1, %v1349_v23  ;;  %v1814_v49 = vadd.f32 %v4011_v9, %v1581_v35  ;;  %v4279_v52 = vld [vmem:[#allocation13_spill] sm:$0xff]  ;;  %v4281_v35 = vld [vmem:[#allocation12_spill] sm:$0xff] }
 0x141   : > { %v4050_v57 = vpop.f32.mrf.mxu0  ;;  %v1588_v8 = vadd.f32 %v4279_v52, %v1358_v44 }
 0x142   : > { %v4048_v27 = vpop.f32.mrf.mxu1  ;;  %v1812_v33 = vadd.f32 %v1733_v3, %v1579_v61  ;;  %v1815_v61 = vadd.f32 %v3182_v5, %v1582_v56  ;;  %v1360_v5 = vadd.f32 %v3989_v48, %v1130_v37  ;;  %v1816_v48 = vadd.f32 %v4015_v17, %v1583_v47  ;;  %v4278_v56 = vld [vmem:[#allocation11_spill] sm:$0xff] }
 0x143   : > { %v4055_v21 = vpop.f32.mrf.mxu0  ;;  %v1819_v13 = vadd.f32 %v4278_v56, %v1586_v40  ;;  %v4282_v32 = vld [vmem:[#allocation15_spill] sm:$0xff] }
 0x144   : > { %v4053_v53 = vpop.f32.mrf.mxu1  ;;  %v4285_v44 = vld [vmem:[#allocation17_spill] sm:$0xff]  ;;  %v4287_v40 = vld [vmem:[#allocation7_spill] sm:$0xff] }
 0x145   : > { %v4062_v29 = vpop.f32.mrf.mxu0  ;;  %v1590_v2 = vadd.f32 %v4285_v44, %v1360_v5 }
 0x146   : > { %v4060_v34 = vpop.f32.mrf.mxu1 }
 0x147   : > { %v3231_v31 = vpop.f32.mrf.mxu0 }
 0x148   : > { %v3205_v23 = vpop.f32.mrf.mxu1 }
 0x149   : > { %v2043_v60 = vadd.f32 %v3205_v23, %v1813_v16  ;;  %v2193_v39 = vpop.f32.mrf.mxu0  ;;  %v1131_v16 = vadd.f32 %v4277_v38, %v3956_v19  ;;  %v1587_v19 = vadd.f32 %v4282_v32, %v1357_v20  ;;  %v4286_v20 = vld [vmem:[#allocation2_spill] sm:$0xff] }
 0x14a   : > { %v1963_v18 = vpop.f32.mrf.mxu1 }
 0x14b   : > { %v2273_v36 = vadd.f32 %v3231_v31, %v2043_v60  ;;  %v2042_v63 = vadd.f32 %v1963_v18, %v1812_v33  ;;  %v3234_v7 = vpop.f32.mrf.mxu0  ;;  %v1362_v33 = vadd.f32 %v4280_v46, %v1132_v24  ;;  %v1818_v60 = vadd.f32 %v4281_v35, %v1585_v51  ;;  %v4294_v46 = vld [vmem:[#allocation10_spill] sm:$0xff] }
 0x14c   : > { %v3208_v0 = vpop.f32.mrf.mxu1 }
 0x14d   : > { %v4089_v1 = vadd.f32 %v4082_v58, %v2273_v36  ;;  %v2272_v3 = vadd.f32 %v2193_v39, %v2042_v63  ;;  %v2045_v4 = vadd.f32 %v3208_v0, %v1815_v61  ;;  %v2203_v11 = vpop.f32.mrf.mxu0  ;;  %v4283_v61 = vld [vmem:[#allocation6_spill] sm:$0xff] }
 0x14e   : > { %v1973_v43 = vpop.f32.mrf.mxu1  ;;  %v1361_v36 = vadd.f32 %v4283_v61, %v1131_v16  ;;  %v4284_v63 = vld [vmem:[#allocation14_spill] sm:$0xff]  ;;  %v4292_v16 = vld [vmem:[#allocation19_spill] sm:$0xff] }
 0x14f   : > { %v2849_v15 = vmul.f32 -1.442695, %v4089_v1  ;;  %v4097_v12 = vadd.f32 %v4082_v58, %v2272_v3  ;;  %v2275_v9 = vadd.f32 %v3234_v7, %v2045_v4  ;;  %v2044_v26 = vadd.f32 %v1973_v43, %v1814_v49  ;;  %v3237_v10 = vpop.f32.mrf.mxu0 }
 0x150   : > { %v3211_v30 = vpop.f32.mrf.mxu1  ;;  %v1821_v62 = vadd.f32 %v4284_v63, %v1588_v8  ;;  %v1134_v43 = vadd.f32 %v4287_v40, %v4286_v20  ;;  %v1589_v56 = vadd.f32 %v4292_v16, %v1359_v6 }
 0x151   : > { %3296 = vpow2.f32 %v2849_v15  ;;  %v2848_v14 = vmul.f32 -1.442695, %v4097_v12  ;;  %v4106_v25 = vadd.f32 %v4082_v58, %v2275_v9  ;;  %v2274_v28 = vadd.f32 %v2203_v11, %v2044_v26  ;;  %v2213_v42 = vpop.f32.mrf.mxu0  ;;  %v4288_v11 = vld [vmem:[#allocation3_spill] sm:$0xff]  ;;  %v4289_v15 = vld [vmem:[#allocation9_spill] sm:$0xff]  ;;  %v4290_v26 = vld [vmem:[#allocation16_spill] sm:$0xff] }
 0x152   : > { %v2047_v59 = vadd.f32 %v3211_v30, %v1817_v45  ;;  %v1983_v17 = vpop.f32.mrf.mxu1  ;;  %v1133_v9 = vadd.f32 %v4289_v15, %v4288_v11  ;;  %v1820_v24 = vadd.f32 %v4290_v26, %v1587_v19 }
 0x153   : > { %3298 = vpow2.f32 %v2848_v14  ;;  %v2851_v22 = vmul.f32 -1.442695, %v4106_v25  ;;  %v4114_v23 = vadd.f32 %v4082_v58, %v2274_v28  ;;  %v2046_v31 = vadd.f32 %v1983_v17, %v1816_v48  ;;  %v3240_v54 = vpop.f32.mrf.mxu0  ;;  %v4291_v28 = vld [vmem:[#allocation18_spill] sm:$0xff] }
 0x154   : > { %v2277_v50 = vadd.f32 %v3237_v10, %v2047_v59  ;;  %v3214_v37 = vpop.f32.mrf.mxu1  ;;  %v1823_v38 = vadd.f32 %v4291_v28, %v1590_v2  ;;  %v1363_v35 = vadd.f32 %v4294_v46, %v1133_v9 }
 0x155   : > { %3300 = vpow2.f32 %v2851_v22  ;;  %v2850_v18 = vmul.f32 -1.442695, %v4114_v23  ;;  %v2276_v39 = vadd.f32 %v2213_v42, %v2046_v31  ;;  %v2049_v41 = vadd.f32 %v3214_v37, %v1819_v13  ;;  %v2223_v7 = vpop.f32.mrf.mxu0  ;;  %v4293_v22 = vld [vmem:[#allocation8_spill] sm:$0xff] }
 0x156   : > { %v4124_v47 = vadd.f32 %v4082_v58, %v2277_v50  ;;  %v1993_v0 = vpop.f32.mrf.mxu1  ;;  %v1592_v13 = vadd.f32 %v4043_v55, %v1362_v33  ;;  %v1364_v31 = vadd.f32 %v4293_v22, %v1134_v43 }
 0x157   : > { %3302 = vpow2.f32 %v2850_v18  ;;  %v4127_v49 = vadd.f32 %v4082_v58, %v2276_v39  ;;  %v2279_v3 = vadd.f32 %v3240_v54, %v2049_v41  ;;  %v2048_v4 = vadd.f32 %v1993_v0, %v1818_v60  ;;  %v3243_v48 = vpop.f32.mrf.mxu0  ;;  %v4295_v54 = vld [vmem:[#allocation20_spill] sm:$0xff]  ;;  %v4296_v39 = vld [vmem:[#allocation21_spill] sm:$0xff] }
 0x158   : > { %v2853_v5 = vmul.f32 -1.442695, %v4124_v47  ;;  %v3217_v45 = vpop.f32.mrf.mxu1  ;;  %v1591_v60 = vadd.f32 %v4048_v27, %v1361_v36  ;;  %v1822_v18 = vadd.f32 %v4295_v54, %v1589_v56  ;;  %v1825_v41 = vadd.f32 %v4296_v39, %v1592_v13 }
 0x159   : > { %v2852_v51 = vmul.f32 -1.442695, %v4127_v49  ;;  %v4137_v30 = vadd.f32 %v4082_v58, %v2279_v3  ;;  %v2278_v10 = vadd.f32 %v2223_v7, %v2048_v4  ;;  %v2051_v14 = vadd.f32 %v3217_v45, %v1821_v62  ;;  %v2233_v8 = vpop.f32.mrf.mxu0 }
 0x15a   : > { %3304 = vpow2.f32 %v2853_v5  ;;  %v2003_v52 = vpop.f32.mrf.mxu1  ;;  %v1594_v61 = vadd.f32 %v4053_v53, %v1364_v31  ;;  %v1824_v7 = vadd.f32 %v4050_v57, %v1591_v60  ;;  %v1593_v3 = vadd.f32 %v4060_v34, %v1363_v35 }
 0x15b   : > { %3306 = vpow2.f32 %v2852_v51  ;;  %v2855_v59 = vmul.f32 -1.442695, %v4137_v30  ;;  %v4144_v17 = vadd.f32 %v4082_v58, %v2278_v10  ;;  %v2281_v42 = vadd.f32 %v3243_v48, %v2051_v14  ;;  %v3246_v19 = vpop.f32.mrf.mxu0 }
 0x15c   : > { %v2050_v32 = vadd.f32 %v2003_v52, %v1820_v24  ;;  %v3220_v6 = vpop.f32.mrf.mxu1  ;;  %v1827_v15 = vadd.f32 %v4055_v21, %v1594_v61  ;;  %v1826_v14 = vadd.f32 %v4062_v29, %v1593_v3 }
 0x15d   : > { %3308 = vpow2.f32 %v2855_v59  ;;  %v2854_v55 = vmul.f32 -1.442695, %v4144_v17  ;;  %v4152_v33 = vadd.f32 %v4082_v58, %v2281_v42  ;;  %v2053_v50 = vadd.f32 %v3220_v6, %v1823_v38  ;;  %v2243_v63 = vpop.f32.mrf.mxu0 }
 0x15e   : > { %v3297_v37 = vpop.eup %3296  ;;  %v2280_v27 = vadd.f32 %v2233_v8, %v2050_v32  ;;  %v2013_v36 = vpop.f32.mrf.mxu1 }
 0x15f   : > { %v2360_v62 = vadd.f32 1.0, %v3297_v37  ;;  %3310 = vpow2.f32 %v2854_v55  ;;  %v2857_v44 = vmul.f32 -1.442695, %v4152_v33  ;;  %v2283_v2 = vadd.f32 %v3246_v19, %v2053_v50  ;;  %v3249_v40 = vpop.f32.mrf.mxu0 }
 0x160   : > { %v3299_v0 = vpop.eup %3298  ;;  %v4167_v53 = vadd.f32 %v4082_v58, %v2280_v27  ;;  %v2052_v4 = vadd.f32 %v2013_v36, %v1822_v18  ;;  %v3223_v20 = vpop.f32.mrf.mxu1 }
 0x161   : > { %3312 = vrcp.f32 %v2360_v62  ;;  %v2359_v43 = vadd.f32 1.0, %v3299_v0  ;;  %v4170_v11 = vadd.f32 %v4082_v58, %v2283_v2  ;;  %v2055_v57 = vadd.f32 %v3223_v20, %v1825_v41  ;;  %v2253_v5 = vpop.f32.mrf.mxu0 }
 0x162   : > { %v3301_v34 = vpop.eup %3300  ;;  %3314 = vpow2.f32 %v2857_v44  ;;  %v2856_v9 = vmul.f32 -1.442695, %v4167_v53  ;;  %v2282_v26 = vadd.f32 %v2243_v63, %v2052_v4  ;;  %v2023_v24 = vpop.f32.mrf.mxu1 }
 0x163   : > { %3316 = vrcp.f32 %v2359_v43  ;;  %v2362_v45 = vadd.f32 1.0, %v3301_v34  ;;  %v2859_v48 = vmul.f32 -1.442695, %v4170_v11  ;;  %v2285_v51 = vadd.f32 %v3249_v40, %v2055_v57  ;;  %v3252_v16 = vpop.f32.mrf.mxu0 }
 0x164   : > { %v3303_v10 = vpop.eup %3302  ;;  %3318 = vpow2.f32 %v2856_v9  ;;  %v4181_v21 = vadd.f32 %v4082_v58, %v2282_v26  ;;  %v2054_v28 = vadd.f32 %v2023_v24, %v1824_v7  ;;  %v3226_v38 = vpop.f32.mrf.mxu1 }
 0x165   : > { %3320 = vrcp.f32 %v2362_v45  ;;  %v2361_v56 = vadd.f32 1.0, %v3303_v10  ;;  %v4185_v13 = vadd.f32 %v4082_v58, %v2285_v51  ;;  %v2057_v52 = vadd.f32 %v3226_v38, %v1827_v15  ;;  %v2263_v6 = vpop.f32.mrf.mxu0 }
 0x166   : > { %3322 = vpow2.f32 %v2859_v48  ;;  %v2858_v29 = vmul.f32 -1.442695, %v4181_v21  ;;  %v2284_v8 = vadd.f32 %v2253_v5, %v2054_v28  ;;  %v2033_v59 = vpop.f32.mrf.mxu1 }
 0x167   : > { %v3305_v42 = vpop.eup %3304  ;;  %3324 = vrcp.f32 %v2361_v56  ;;  %v2861_v22 = vmul.f32 -1.442695, %v4185_v13  ;;  %v2287_v31 = vadd.f32 %v3252_v16, %v2057_v52  ;;  %v2056_v46 = vadd.f32 %v2033_v59, %v1826_v14 }
 0x168   : > { %v3307_v35 = vpop.eup %3306  ;;  %v2364_v60 = vadd.f32 1.0, %v3305_v42  ;;  %3326 = vpow2.f32 %v2858_v29  ;;  %v4190_v32 = vadd.f32 %v4082_v58, %v2284_v8 }
 0x169   : > { %v2363_v19 = vadd.f32 1.0, %v3307_v35  ;;  %3328 = vpow2.f32 %v2861_v22  ;;  %v4193_v55 = vadd.f32 %v4082_v58, %v2287_v31  ;;  %v2286_v50 = vadd.f32 %v2263_v6, %v2056_v46 }
 0x16a   : > { %v3309_v37 = vpop.eup %3308  ;;  %3330 = vrcp.f32 %v2364_v60  ;;  %v2860_v54 = vmul.f32 -1.442695, %v4190_v32 }
 0x16b   : > { %3332 = vrcp.f32 %v2363_v19  ;;  %v2366_v18 = vadd.f32 1.0, %v3309_v37  ;;  %v2863_v39 = vmul.f32 -1.442695, %v4193_v55  ;;  %v4198_v41 = vadd.f32 %v4082_v58, %v2286_v50 }
 0x16c   : > { %v3311_v61 = vpop.eup %3310  ;;  %3334 = vpow2.f32 %v2860_v54 }
 0x16d   : > { %3336 = vrcp.f32 %v2366_v18  ;;  %v2365_v27 = vadd.f32 1.0, %v3311_v61  ;;  %v2862_v36 = vmul.f32 -1.442695, %v4198_v41 }
 0x16e   : > { %v3313_v63 = vpop.eup %3312  ;;  %3338 = vpow2.f32 %v2863_v39 }
 0x16f   : > { %v3315_v62 = vpop.eup %3314  ;;  %v2408_v44 = vmul.f32 %v3313_v63, %v4089_v1  ;;  %3340 = vrcp.f32 %v2365_v27 }
 0x170   : > { %v3317_v58 = vpop.eup %3316  ;;  %v2368_v2 = vadd.f32 1.0, %v3315_v62  ;;  %3342 = vpow2.f32 %v2862_v36 }
 0x171   : > { %v3319_v0 = vpop.eup %3318  ;;  %2424 = vst [vmem:[%s4204_s30 + $0x8] sm:$0xff] %v2408_v44  ;;  %v2407_v7 = vmul.f32 %v3317_v58, %v4097_v12 }
 0x172   : > { %v3321_v3 = vpop.eup %3320  ;;  %3344 = vrcp.f32 %v2368_v2  ;;  %v2367_v4 = vadd.f32 1.0, %v3319_v0 }
 0x173   : > { %v3323_v20 = vpop.eup %3322  ;;  %2423 = vst [vmem:[%s4204_s30] sm:$0xff] %v2407_v7  ;;  %v2410_v40 = vmul.f32 %v3321_v3, %v4106_v25 }
 0x174   : > { %v3325_v43 = vpop.eup %3324  ;;  %3346 = vrcp.f32 %v2367_v4  ;;  %v2370_v1 = vadd.f32 1.0, %v3323_v20 }
 0x175   : > { %v3327_v57 = vpop.eup %3326  ;;  %2426 = vst [vmem:[%s4204_s30 + $0x18] sm:$0xff] %v2410_v40  ;;  %v2409_v34 = vmul.f32 %v3325_v43, %v4114_v23 }
 0x176   : > { %v3329_v15 = vpop.eup %3328  ;;  %3348 = vrcp.f32 %v2370_v1  ;;  %v2369_v12 = vadd.f32 1.0, %v3327_v57 }
 0x177   : > { %v3331_v9 = vpop.eup %3330  ;;  %2425 = vst [vmem:[%s4204_s30 + $0x10] sm:$0xff] %v2409_v34  ;;  %v2372_v26 = vadd.f32 1.0, %v3329_v15 }
 0x178   : > { %v3333_v24 = vpop.eup %3332  ;;  %v2412_v5 = vmul.f32 %v3331_v9, %v4124_v47  ;;  %3350 = vrcp.f32 %v2369_v12 }
 0x179   : > { %v3335_v25 = vpop.eup %3334  ;;  %v2411_v45 = vmul.f32 %v3333_v24, %v4127_v49  ;;  %3352 = vrcp.f32 %v2372_v26 }
 0x17a   : > { %v3337_v48 = vpop.eup %3336  ;;  %2428 = vst [vmem:[%s4204_s30 + $0x28] sm:$0xff] %v2412_v5  ;;  %v2371_v23 = vadd.f32 1.0, %v3335_v25 }
 0x17b   : > { %v3339_v51 = vpop.eup %3338  ;;  %2427 = vst [vmem:[%s4204_s30 + $0x20] sm:$0xff] %v2411_v45  ;;  %v2414_v10 = vmul.f32 %v3337_v48, %v4137_v30 }
 0x17c   : > { %v3341_v14 = vpop.eup %3340  ;;  %3354 = vrcp.f32 %v2371_v23  ;;  %v2374_v28 = vadd.f32 1.0, %v3339_v51 }
 0x17d   : > { %v3343_v38 = vpop.eup %3342  ;;  %2430 = vst [vmem:[%s4204_s30 + $0x38] sm:$0xff] %v2414_v10  ;;  %v2413_v47 = vmul.f32 %v3341_v14, %v4144_v17 }
 0x17e   : > { %3356 = vrcp.f32 %v2374_v28  ;;  %v2373_v49 = vadd.f32 1.0, %v3343_v38 }
 0x17f   : > { %v3345_v16 = vpop.eup %3344  ;;  %2429 = vst [vmem:[%s4204_s30 + $0x30] sm:$0xff] %v2413_v47 }
 0x180   : > { %v2416_v56 = vmul.f32 %v3345_v16, %v4152_v33  ;;  %3358 = vrcp.f32 %v2373_v49 }
 0x181   : > { %v3347_v52 = vpop.eup %3346 }
 0x182   : > { %2432 = vst [vmem:[%s4204_s30 + $0x48] sm:$0xff] %v2416_v56  ;;  %v2415_v30 = vmul.f32 %v3347_v52, %v4167_v53 }
 0x183   : > { %v3349_v29 = vpop.eup %3348 }
 0x184   : > { %2431 = vst [vmem:[%s4204_s30 + $0x40] sm:$0xff] %v2415_v30  ;;  %v2418_v8 = vmul.f32 %v3349_v29, %v4170_v11 }
 0x185   : > { %v3351_v17 = vpop.eup %3350 }
 0x186   : > { %v3353_v59 = vpop.eup %3352  ;;  %2434 = vst [vmem:[%s4204_s30 + $0x58] sm:$0xff] %v2418_v8  ;;  %v2417_v42 = vmul.f32 %v3351_v17, %v4181_v21 }
 0x187   : > { %v2420_v22 = vmul.f32 %v3353_v59, %v4185_v13 }
 0x188   : > { %2433 = vst [vmem:[%s4204_s30 + $0x50] sm:$0xff] %v2417_v42 }
 0x189   : > { %v3355_v33 = vpop.eup %3354  ;;  %2436 = vst [vmem:[%s4204_s30 + $0x68] sm:$0xff] %v2420_v22 }
 0x18a   : > { %v2419_v31 = vmul.f32 %v3355_v33, %v4190_v32 }
 0x18b   : > { %v3357_v46 = vpop.eup %3356 }
 0x18c   : > { %2435 = vst [vmem:[%s4204_s30 + $0x60] sm:$0xff] %v2419_v31  ;;  %v2422_v53 = vmul.f32 %v3357_v46, %v4193_v55 }
 0x18d   : > { %v3359_v35 = vpop.eup %3358 }
 0x18e   : > { %2438 = vst [vmem:[%s4204_s30 + $0x78] sm:$0xff] %v2422_v53  ;;  %v2421_v11 = vmul.f32 %v3359_v35, %v4198_v41 }
 0x190   : > { %2437 = vst [vmem:[%s4204_s30 + $0x70] sm:$0xff] %v2421_v11 }
 0x191 PF: > { %s13_s16 = sadd.s32 1, %s3398_s16   ;;  %s4298_s12 = smov %s3390_s14 }
 0x192   : > { %p10_p7 = scmp.ge.s32.totalorder %s13_s16, 6   ;;  %s4299_s13 = smov %s3394_s15 }
 0x193   : > { %s4300_s14 = smov %s4303_s17  ;;  %s4301_s15 = smov %s4307_s18 }
 0x194   :  { %12 = sbr.rel (!%p10_p7) target bundleno = 3 (0x3), region = 79 }

</bundles_post_ra>
